<compile_context>
chip_gen: v7x
topology: tpu7x:2x2x1
jax: 0.10.0
libtpu: 0.0.40
codegen_flags: <defaults>
</compile_context>

<pallas_src>
import jax
import jax.numpy as jnp
from jax.experimental import pallas as pl
from jax.experimental.pallas import tpu as pltpu


def mlp_kernel(x_ref, w0_ref, b0_ref, wh_ref, bh_ref, o_ref):
    """Fused MLP forward: Linear->ReLU, then (nLayers-1) x [Linear->ReLU].

    x_ref : (TB, D)             input tile (compute dtype)
    w0_ref: (D, HP)             first-layer weight (in, out), HP = pad128(H)
    b0_ref: (1, HP)   f32       first-layer bias (zeros in padded lanes)
    wh_ref: (L-1, HP, HP)       stacked hidden-layer weights
    bh_ref: (L-1, 1, HP) f32    stacked hidden-layer biases
    o_ref : (TB, HP)  f32       output tile (padded lanes stay exactly zero)
    """
    cd = w0_ref.dtype
    # Layer 0: MXU matmul, f32 accumulation, f32 bias+ReLU epilogue.
    h = jnp.dot(x_ref[...], w0_ref[...], preferred_element_type=jnp.float32)
    h = jnp.maximum(h + b0_ref[...], 0.0)

    # Hidden layers: static trip count -> fully unrolled; activation stays in
    # vregs between layers (no vst/vld round trip through VMEM scratch).
    for i in range(wh_ref.shape[0]):
        hi = jnp.dot(h.astype(cd), wh_ref[i],
                     preferred_element_type=jnp.float32)
        h = jnp.maximum(hi + bh_ref[i], 0.0)

    o_ref[...] = h.astype(o_ref.dtype)


def _round_up(x, m):
    return ((x + m - 1) // m) * m


def embedder_forward(x, w0, b0, wh, bh, *, tile_b=None,
                     compute_dtype=jnp.float32):
    """Pallas wrapper.

    Tiles over the batch only; all weights stay fully resident in VMEM for
    every grid step.  The hidden dim is zero-padded to a multiple of 128 so
    every activation / output store is lane-dense; the padding is inert
    (zero weights + zero bias -> ReLU keeps padded lanes at 0) and is sliced
    off before returning.
    """
    B, D = x.shape
    H = w0.shape[1]
    L1 = wh.shape[0]
    HP = _round_up(H, 128)

    if tile_b is None:
        # Single tile for small batches (grid-step overhead dominates there);
        # 256/128-row tiles once B grows so the MXU M dim stays full and
        # v7x's two TensorCores both get grid steps.
        if B <= 256:
            tile_b = B
        else:
            tile_b = next((t for t in (256, 128, 64, 32, 16, 8)
                           if B % t == 0), B)
    assert B % tile_b == 0

    cd = compute_dtype
    xq = x.astype(cd)
    w0p = jnp.zeros((D, HP), cd).at[:, :H].set(w0.astype(cd))
    b0p = jnp.zeros((1, HP), jnp.float32).at[:, :H].set(b0.astype(jnp.float32))
    whp = jnp.zeros((L1, HP, HP), cd).at[:, :H, :H].set(wh.astype(cd))
    bhp = jnp.zeros((L1, 1, HP), jnp.float32).at[:, :, :H].set(
        bh.astype(jnp.float32))

    itemsize = jnp.dtype(cd).itemsize
    cost = pl.CostEstimate(
        flops=2 * B * (D * HP + L1 * HP * HP),
        transcendentals=0,
        bytes_accessed=(B * D + D * HP + L1 * HP * HP) * itemsize
                       + (HP + L1 * HP) * 4 + B * HP * 4,
    )

    grid = (B // tile_b,)
    out_p = pl.pallas_call(
        mlp_kernel,
        out_shape=jax.ShapeDtypeStruct((B, HP), jnp.float32),
        grid_spec=pltpu.PrefetchScalarGridSpec(
            num_scalar_prefetch=0,
            grid=grid,
            in_specs=[
                pl.BlockSpec((tile_b, D), lambda i: (i, 0)),        # x tile
                pl.BlockSpec((D, HP), lambda i: (0, 0)),            # w0
                pl.BlockSpec((1, HP), lambda i: (0, 0)),            # b0
                pl.BlockSpec((L1, HP, HP), lambda i: (0, 0, 0)),    # wh stack
                pl.BlockSpec((L1, 1, HP), lambda i: (0, 0, 0)),     # bh stack
            ],
            out_specs=pl.BlockSpec((tile_b, HP), lambda i: (i, 0)),
        ),
        compiler_params=pltpu.CompilerParams(
            dimension_semantics=("parallel",)),
        cost_estimate=cost,
    )(xq, w0p, b0p, whp, bhp)

    return out_p[:, :H]


def init_params(key, input_dim, n_layers, hidden_dim):
    """Deterministic PyTorch-style init: U(-1/sqrt(fan_in), 1/sqrt(fan_in)).
    Weights stored already transposed to (in_features, out_features)."""
    assert n_layers >= 2, "kernel assumes at least one hidden layer"
    keys = jax.random.split(key, 2 * n_layers)
    bound0 = 1.0 / jnp.sqrt(input_dim)
    w0 = jax.random.uniform(keys[0], (input_dim, hidden_dim),
                            jnp.float32, -bound0, bound0)
    b0 = jax.random.uniform(keys[1], (1, hidden_dim),
                            jnp.float32, -bound0, bound0)

    boundh = 1.0 / jnp.sqrt(hidden_dim)
    wh_list, bh_list = [], []
    for l in range(n_layers - 1):
        wh_list.append(jax.random.uniform(keys[2 + 2 * l],
                                          (hidden_dim, hidden_dim),
                                          jnp.float32, -boundh, boundh))
        bh_list.append(jax.random.uniform(keys[3 + 2 * l],
                                          (1, hidden_dim),
                                          jnp.float32, -boundh, boundh))
    wh = jnp.stack(wh_list, axis=0)        # (nLayers-1, H, H)
    bh = jnp.stack(bh_list, axis=0)        # (nLayers-1, 1, H)
    return w0, b0, wh, bh


def reference_forward(x, w0, b0, wh, bh, compute_dtype=jnp.float32):
    cd = compute_dtype
    h = jnp.dot(x.astype(cd), w0.astype(cd),
                preferred_element_type=jnp.float32)
    h = jnp.maximum(h + b0, 0.0)
    for l in range(wh.shape[0]):
        h = jnp.maximum(
            jnp.dot(h.astype(cd), wh[l].astype(cd),
                    preferred_element_type=jnp.float32) + bh[l], 0.0)
    return h


if __name__ == "__main__":
    # EmbedderNetwork(input_dim=32, nLayers=3, hidden_dim=64), batch=16
    B, D, H, N_LAYERS = 16, 32, 64, 3

    key = jax.random.PRNGKey(0)
    kx, kp = jax.random.split(key)
    x = jax.random.normal(kx, (B, D), jnp.float32)
    w0, b0, wh, bh = init_params(kp, D, N_LAYERS, H)

    # f32 path (tight check against the pure-JAX reference).
    out = jax.block_until_ready(
        embedder_forward(x, w0, b0, wh, bh, compute_dtype=jnp.float32))
    ref = reference_forward(x, w0, b0, wh, bh, jnp.float32)
    assert out.shape == (B, H)
    assert jnp.allclose(out, ref, atol=1e-5, rtol=1e-5)

    # bf16 compute path (v6e/v7x recommendation): bf16 x / weights on the MXU
    # with f32 accumulation and f32 epilogue; compared against a bf16-aware
    # reference.
    out_bf16 = jax.block_until_ready(
        embedder_forward(x, w0, b0, wh, bh, compute_dtype=jnp.bfloat16))
    ref_bf16 = reference_forward(x, w0, b0, wh, bh, jnp.bfloat16)
    assert out_bf16.shape == (B, H)
    assert jnp.allclose(out_bf16, ref_bf16, atol=2e-2, rtol=2e-2)

    print("KERNEL_OK")
</pallas_src>

<mosaic_0001>
module attributes {stable_mosaic.version = 11 : i64} {
  func.func @mlp_kernel(%arg0: i32, %arg1: memref<16x32xf32, #tpu.memory_space<vmem>>, %arg2: memref<32x128xf32, #tpu.memory_space<vmem>>, %arg3: memref<1x128xf32, #tpu.memory_space<vmem>>, %arg4: memref<2x128x128xf32, #tpu.memory_space<vmem>>, %arg5: memref<2x1x128xf32, #tpu.memory_space<vmem>>, %arg6: memref<16x128xf32, #tpu.memory_space<vmem>>) attributes {dimension_semantics = [#tpu.dimension_semantics<parallel>], iteration_bounds = array<i64: 1>, scalar_prefetch = 0 : i64, scratch_operands = 0 : i64, tpu.core_type = #tpu.core_type<tc>, window_params = [{transform_indices = @transform_0, window_bounds = array<i64: 16, 32>}, {pipeline_mode = #tpu.pipeline_mode<synchronous>, transform_indices = @transform_1, window_bounds = array<i64: 32, 128>}, {pipeline_mode = #tpu.pipeline_mode<synchronous>, transform_indices = @transform_2, window_bounds = array<i64: 1, 128>}, {pipeline_mode = #tpu.pipeline_mode<synchronous>, transform_indices = @transform_3, window_bounds = array<i64: 2, 128, 128>}, {pipeline_mode = #tpu.pipeline_mode<synchronous>, transform_indices = @transform_4, window_bounds = array<i64: 2, 1, 128>}, {transform_indices = @transform_5, window_bounds = array<i64: 16, 128>}]} {
    %c0 = arith.constant 0 : index
    %c0_0 = arith.constant 0 : index
    %0 = vector.load %arg1[%c0, %c0_0] : memref<16x32xf32, #tpu.memory_space<vmem>>, vector<16x32xf32>
    %c0_1 = arith.constant 0 : index
    %c0_2 = arith.constant 0 : index
    %1 = vector.load %arg2[%c0_1, %c0_2] : memref<32x128xf32, #tpu.memory_space<vmem>>, vector<32x128xf32>
    %cst = arith.constant dense<0.000000e+00> : vector<16x128xf32>
    %2 = tpu.matmul %0, %1, %cst {dimension_numbers = #tpu.dot_dimension_numbers<[1], [0], [0], [1], [0, 0, 1, 1], [], []>} : vector<16x32xf32>, vector<32x128xf32>, vector<16x128xf32> -> vector<16x128xf32>
    %c0_3 = arith.constant 0 : index
    %c0_4 = arith.constant 0 : index
    %3 = vector.load %arg3[%c0_3, %c0_4] : memref<1x128xf32, #tpu.memory_space<vmem>>, vector<1x128xf32>
    %4 = vector.broadcast %3 : vector<1x128xf32> to vector<16x128xf32>
    %5 = arith.addf %2, %4 : vector<16x128xf32>
    %cst_5 = arith.constant 0.000000e+00 : f32
    %6 = vector.broadcast %cst_5 : f32 to vector<16x128xf32>
    %7 = arith.maximumf %5, %6 : vector<16x128xf32>
    %c0_6 = arith.constant 0 : index
    %c0_7 = arith.constant 0 : index
    %c0_8 = arith.constant 0 : index
    %8 = vector.load %arg4[%c0_6, %c0_7, %c0_8] : memref<2x128x128xf32, #tpu.memory_space<vmem>>, vector<1x128x128xf32>
    %9 = vector.shape_cast %8 : vector<1x128x128xf32> to vector<128x128xf32>
    %cst_9 = arith.constant dense<0.000000e+00> : vector<16x128xf32>
    %10 = tpu.matmul %7, %9, %cst_9 {dimension_numbers = #tpu.dot_dimension_numbers<[1], [0], [0], [1], [0, 0, 1, 1], [], []>} : vector<16x128xf32>, vector<128x128xf32>, vector<16x128xf32> -> vector<16x128xf32>
    %c0_10 = arith.constant 0 : index
    %c0_11 = arith.constant 0 : index
    %c0_12 = arith.constant 0 : index
    %11 = vector.load %arg5[%c0_10, %c0_11, %c0_12] : memref<2x1x128xf32, #tpu.memory_space<vmem>>, vector<1x1x128xf32>
    %12 = vector.shape_cast %11 : vector<1x1x128xf32> to vector<1x128xf32>
    %13 = vector.broadcast %12 : vector<1x128xf32> to vector<16x128xf32>
    %14 = arith.addf %10, %13 : vector<16x128xf32>
    %cst_13 = arith.constant 0.000000e+00 : f32
    %15 = vector.broadcast %cst_13 : f32 to vector<16x128xf32>
    %16 = arith.maximumf %14, %15 : vector<16x128xf32>
    %c1 = arith.constant 1 : index
    %c0_14 = arith.constant 0 : index
    %c0_15 = arith.constant 0 : index
    %17 = vector.load %arg4[%c1, %c0_14, %c0_15] : memref<2x128x128xf32, #tpu.memory_space<vmem>>, vector<1x128x128xf32>
    %18 = vector.shape_cast %17 : vector<1x128x128xf32> to vector<128x128xf32>
    %cst_16 = arith.constant dense<0.000000e+00> : vector<16x128xf32>
    %19 = tpu.matmul %16, %18, %cst_16 {dimension_numbers = #tpu.dot_dimension_numbers<[1], [0], [0], [1], [0, 0, 1, 1], [], []>} : vector<16x128xf32>, vector<128x128xf32>, vector<16x128xf32> -> vector<16x128xf32>
    %c1_17 = arith.constant 1 : index
    %c0_18 = arith.constant 0 : index
    %c0_19 = arith.constant 0 : index
    %20 = vector.load %arg5[%c1_17, %c0_18, %c0_19] : memref<2x1x128xf32, #tpu.memory_space<vmem>>, vector<1x1x128xf32>
    %21 = vector.shape_cast %20 : vector<1x1x128xf32> to vector<1x128xf32>
    %22 = vector.broadcast %21 : vector<1x128xf32> to vector<16x128xf32>
    %23 = arith.addf %19, %22 : vector<16x128xf32>
    %cst_20 = arith.constant 0.000000e+00 : f32
    %24 = vector.broadcast %cst_20 : f32 to vector<16x128xf32>
    %25 = arith.maximumf %23, %24 : vector<16x128xf32>
    %c0_21 = arith.constant 0 : index
    %c0_22 = arith.constant 0 : index
    %26 = vector.load %arg6[%c0_21, %c0_22] : memref<16x128xf32, #tpu.memory_space<vmem>>, vector<16x128xf32>
    tpu.vector_store %arg6[%c0_21, %c0_22], %25 {strides = array<i32>} : memref<16x128xf32, #tpu.memory_space<vmem>>, vector<16x128xf32>,
    return
  }
  func.func @transform_0(%arg0: i32) -> (i32, i32) {
    %c0_i32 = arith.constant 0 : i32
    %c0_i32_0 = arith.constant 0 : i32
    return %arg0, %c0_i32 : i32, i32
  }
  func.func @transform_1(%arg0: i32) -> (i32, i32) {
    %c0_i32 = arith.constant 0 : i32
    %c0_i32_0 = arith.constant 0 : i32
    %c0_i32_1 = arith.constant 0 : i32
    return %c0_i32, %c0_i32_0 : i32, i32
  }
  func.func @transform_2(%arg0: i32) -> (i32, i32) {
    %c0_i32 = arith.constant 0 : i32
    %c0_i32_0 = arith.constant 0 : i32
    %c0_i32_1 = arith.constant 0 : i32
    return %c0_i32, %c0_i32_0 : i32, i32
  }
  func.func @transform_3(%arg0: i32) -> (i32, i32, i32) {
    %c0_i32 = arith.constant 0 : i32
    %c0_i32_0 = arith.constant 0 : i32
    %c0_i32_1 = arith.constant 0 : i32
    %c0_i32_2 = arith.constant 0 : i32
    return %c0_i32, %c0_i32_0, %c0_i32_1 : i32, i32, i32
  }
  func.func @transform_4(%arg0: i32) -> (i32, i32, i32) {
    %c0_i32 = arith.constant 0 : i32
    %c0_i32_0 = arith.constant 0 : i32
    %c0_i32_1 = arith.constant 0 : i32
    %c0_i32_2 = arith.constant 0 : i32
    return %c0_i32, %c0_i32_0, %c0_i32_1 : i32, i32, i32
  }
  func.func @transform_5(%arg0: i32) -> (i32, i32) {
    %c0_i32 = arith.constant 0 : i32
    %c0_i32_0 = arith.constant 0 : i32
    return %arg0, %c0_i32 : i32, i32
  }
}

</mosaic_0001>

<bundles_post_ra>
// kernel: tpu_custom_call.1
= control target key start
LH: loop header
LB: loop body
LE: loop exit
PB: predicated region body
PF: predicated region fallthrough
CT: control target
= control target key end

     0   :  { %10 = vsyncpa [#allocation3], 0  ;;  %s796_s0 = inlined_call_operand.hbm [shape: f32[16,32], index: 0, kind: input, shape index: {}]   ;;  %s797_s1 = inlined_call_operand.hbm [shape: f32[32,128], index: 1, kind: input, shape index: {}]   ;;  %s798_s2 = inlined_call_operand.vmem [shape: f32[1,128], index: 2, kind: input, shape index: {}]   ;;  %s799_s3 = inlined_call_operand.hbm [shape: f32[2,128,128], index: 3, kind: input, shape index: {}]   ;;  %s800_s4 = inlined_call_operand.vmem [shape: f32[2,1,128], index: 4, kind: input, shape index: {}]   ;;  %s801_s5 = inlined_call_operand.hbm [shape: f32[16,128], index: 5, kind: output, shape index: {}]  }
   0x1   :  { %11 = vsyncpa [#allocation6], 0 }
   0x2   :  { %12 = vsyncpa [#allocation4], 0  ;;  %s682_s18 = smov [#allocation5]   ;;  %s683_s20 = smov [#allocation2]  }
   0x3   :  { %s30_s19 = sshll.u32 %s682_s18, 4  ;;  %s18_s21 = sshll.u32 %s683_s20, 4  ;;  %s31_s19 = int_to_ptr.vmem [resolvable:$true] %s30_s19  ;;  %s718_s21 = int_to_ptr.vmem [resolvable:$true] %s18_s21 }
   0x4   :  { %s588_s24 = scalar_lea.hbm %s797_s1, 512 }
   0x5   :  { %p589_p0 = scmp.ne.s32.totalorder %s797_s1, %s588_s24  ;;  %p592_p1 = scmp.lt.u32.totalorder %s588_s24, %s797_s1 }
   0x7   :  { %p594_p2 = pnand %p592_p1, %p589_p0 }
   0x9   :  { %597 = shalt.err (!%p594_p2)
}
   0xa   :  { %s598_s29 = scalar_lea.vmem %s31_s19, 512  ;;  %p603_p4 = scmp.lt.s32.totalorder %s31_s19, %s31_s19 }
   0xb   :  { %p599_p3 = scmp.ne.s32.totalorder %s31_s19, %s598_s29  ;;  %p604_p5 = scmp.lt.s32.totalorder %s598_s29, %s598_s29 }
   0xd   :  { %p605_p6 = por %p604_p5, %p603_p4 }
   0xf   :  { %p606_p7 = pnand %p605_p6, %p599_p3 }
  0x11   :  { %609 = shalt.err (!%p606_p7)
}
  0x12   :  { %s684_s30 = smov 128   ;;  %s685_s6 = smov 8  }
  0x13   :  { %36 = dma.hbm_to_vmem [thread:$0]  %s797_s1, 512, %s31_s19, [#allocation6], %s684_s30, %s684_s30, %s685_s6  }
  0x14   :  { %s610_s11 = scalar_lea.hbm %s796_s0, 256 }
  0x15   :  { %p611_p8 = scmp.ne.s32.totalorder %s796_s0, %s610_s11  ;;  %p614_p9 = scmp.lt.u32.totalorder %s610_s11, %s796_s0 }
  0x17   :  { %p616_p10 = pnand %p614_p9, %p611_p8 }
  0x19   :  { %619 = shalt.err (!%p616_p10)
}
  0x1a   :  { %s620_s16 = scalar_lea.vmem %s718_s21, 256  ;;  %p625_p12 = scmp.lt.s32.totalorder %s718_s21, %s718_s21 }
  0x1b   :  { %p621_p11 = scmp.ne.s32.totalorder %s718_s21, %s620_s16  ;;  %p626_p13 = scmp.lt.s32.totalorder %s620_s16, %s620_s16 }
  0x1d   :  { %p627_p0 = por %p626_p13, %p625_p12 }
  0x1f   :  { %p628_p1 = pnand %p627_p0, %p621_p11 }
  0x21   :  { %631 = shalt.err (!%p628_p1)
}
  0x22   :  { %24 = dma.hbm_to_vmem [thread:$0]  %s796_s0, 256, %s718_s21, [#allocation3], %s684_s30, %s684_s30, %s685_s6  }
  0x23   :  { %s686_s18 = smov [#allocation7]   ;;  %s632_s23 = scalar_lea.hbm %s799_s3, 4096 }
  0x24   :  { %s44_s19 = sshll.u32 %s686_s18, 4  ;;  %p633_p2 = scmp.ne.s32.totalorder %s799_s3, %s632_s23  ;;  %s45_s19 = int_to_ptr.vmem [resolvable:$true] %s44_s19 }
  0x25   :  { %p636_p3 = scmp.lt.u32.totalorder %s632_s23, %s799_s3 }
  0x27   :  { %p638_p4 = pnand %p636_p3, %p633_p2 }
  0x29   :  { %641 = shalt.err (!%p638_p4)
}
  0x2a   :  { %s642_s28 = scalar_lea.vmem %s45_s19, 4096  ;;  %p647_p6 = scmp.lt.s32.totalorder %s45_s19, %s45_s19 }
  0x2b   :  { %p643_p5 = scmp.ne.s32.totalorder %s45_s19, %s642_s28  ;;  %p648_p7 = scmp.lt.s32.totalorder %s642_s28, %s642_s28 }
  0x2d   :  { %p649_p8 = por %p648_p7, %p647_p6 }
  0x2f   :  { %p650_p9 = pnand %p649_p8, %p643_p5 }
  0x31   :  { %653 = shalt.err (!%p650_p9)
}
  0x32   :  { %50 = dma.hbm_to_vmem [thread:$0]  %s799_s3, 4096, %s45_s19, [#allocation6], %s684_s30, %s684_s30, %s685_s6  }
  0x33   :  { %676 = dma.done.wait [#allocation3], 256  }
  0x34   :  { %677 = vsyncadd [#allocation3], 4294967040 }
  0x35   :  { %678 = dma.done.wait [#allocation6], 4608  }
  0x36   :  { %679 = vsyncadd [#allocation6], 4294962688  ;;  %vm75_vm0 = vcmask 261120   ;;  %v64_v0 = vld [vmem:[#allocation5] sm:$0xff]  ;;  %v65_v1 = vld [vmem:[#allocation5 + $0x8] sm:$0xff]  ;;  %s687_s10 = smov [#allocation8]  }
  0x37   :  { %v66_v2 = vld [vmem:[#allocation5 + $0x10] sm:$0xff]  ;;  %v510_v3 = vpack.c.bf16 %v65_v1, %v64_v0  ;;  %v67_v4 = vld [vmem:[#allocation5 + $0x18] sm:$0xff]  ;;  %v159_v7 = vld [vmem:[#allocation7] sm:$0xff]  ;;  %s368_s11 = sshll.u32 %s687_s10, 4  ;;  %s369_s11 = int_to_ptr.vmem [resolvable:$true] %s368_s11 }
  0x38   :  { %v62_v5 = vld [vmem:[#allocation2] sm:$0xff]  ;;  %v514_v6 = vpack.c.bf16 %v67_v4, %v66_v2  ;;  %v160_v8 = vld [vmem:[#allocation7 + $0x8] sm:$0xff]  ;;  %v162_v11 = vld [vmem:[#allocation7 + $0x18] sm:$0xff]  ;;  %s654_s12 = scalar_lea.vmem %s369_s11, 256  ;;  %p659_p11 = scmp.lt.s32.totalorder %s369_s11, %s369_s11 }
  0x39   :  { %437 = vmatprep.mubr.msk.f32.mxu0 %vm75_vm0, %v62_v5  ;;  %v161_v9 = vld [vmem:[#allocation7 + $0x10] sm:$0xff]  ;;  %511 = vmatprep.subr.bf16.mxu0 %v510_v3  ;;  %v518_v10 = vpack.c.bf16 %v160_v8, %v159_v7  ;;  %v163_v13 = vld [vmem:[#allocation7 + $0x20] sm:$0xff]  ;;  %v164_v14 = vld [vmem:[#allocation7 + $0x28] sm:$0xff]  ;;  %p655_p10 = scmp.ne.s32.totalorder %s369_s11, %s654_s12  ;;  %p660_p12 = scmp.lt.s32.totalorder %s654_s12, %s654_s12 }
  0x3a   :  { %513 = vmatpush3.bf16.msra.mxu0 %v510_v3  ;;  %v522_v12 = vpack.c.bf16 %v162_v11, %v161_v9  ;;  %v526_v15 = vpack.c.bf16 %v164_v14, %v163_v13  ;;  %v63_v16 = vld [vmem:[#allocation2 + $0x8] sm:$0xff]  ;;  %v165_v17 = vld [vmem:[#allocation7 + $0x30] sm:$0xff]  ;;  %v167_v20 = vld [vmem:[#allocation7 + $0x40] sm:$0xff] }
  0x3b   :  { %515 = vmatprep.subr.bf16.mxu0 %v514_v6  ;;  %519 = vmatprep.subr.bf16.mxu1 %v518_v10  ;;  %v166_v18 = vld [vmem:[#allocation7 + $0x38] sm:$0xff]  ;;  %v168_v21 = vld [vmem:[#allocation7 + $0x48] sm:$0xff]  ;;  %v169_v23 = vld [vmem:[#allocation7 + $0x50] sm:$0xff]  ;;  %p661_p13 = por %p660_p12, %p659_p11 }
  0x3c   :  { %521 = vmatpush3.bf16.msra.mxu1 %v518_v10  ;;  %v530_v19 = vpack.c.bf16 %v166_v18, %v165_v17  ;;  %v534_v22 = vpack.c.bf16 %v168_v21, %v167_v20  ;;  %v170_v24 = vld [vmem:[#allocation7 + $0x58] sm:$0xff]  ;;  %v171_v26 = vld [vmem:[#allocation7 + $0x60] sm:$0xff]  ;;  %v172_v27 = vld [vmem:[#allocation7 + $0x68] sm:$0xff] }
  0x3d   :  { %523 = vmatprep.subr.bf16.mxu1 %v522_v12  ;;  %v538_v25 = vpack.c.bf16 %v170_v24, %v169_v23  ;;  %v542_v28 = vpack.c.bf16 %v172_v27, %v171_v26  ;;  %v173_v29 = vld [vmem:[#allocation7 + $0x70] sm:$0xff]  ;;  %v174_v30 = vld [vmem:[#allocation7 + $0x78] sm:$0xff]  ;;  %v260_v32 = vld [vmem:[#allocation7 + $0x80] sm:$0xff]  ;;  %p662_p0 = pnand %p661_p13, %p655_p10 }
  0x3e   :  { %517 = vmatpush3.bf16.msra.mxu0 %v514_v6  ;;  %v546_v31 = vpack.c.bf16 %v174_v30, %v173_v29  ;;  %v261_v33 = vld [vmem:[#allocation7 + $0x88] sm:$0xff]  ;;  %v262_v34 = vld [vmem:[#allocation7 + $0x90] sm:$0xff]  ;;  %v263_v36 = vld [vmem:[#allocation7 + $0x98] sm:$0xff] }
  0x3f   :  { %v550_v35 = vpack.c.bf16 %v261_v33, %v260_v32  ;;  %v554_v37 = vpack.c.bf16 %v263_v36, %v262_v34  ;;  %v264_v38 = vld [vmem:[#allocation7 + $0xa0] sm:$0xff]  ;;  %v265_v39 = vld [vmem:[#allocation7 + $0xa8] sm:$0xff]  ;;  %v266_v41 = vld [vmem:[#allocation7 + $0xb0] sm:$0xff] }
  0x40   :  { %525 = vmatpush3.bf16.msra.mxu1 %v522_v12  ;;  %v558_v40 = vpack.c.bf16 %v265_v39, %v264_v38  ;;  %v267_v42 = vld [vmem:[#allocation7 + $0xb8] sm:$0xff]  ;;  %v268_v44 = vld [vmem:[#allocation7 + $0xc0] sm:$0xff]  ;;  %v269_v45 = vld [vmem:[#allocation7 + $0xc8] sm:$0xff] }
  0x41   :  { %438 = vmatmul.mubr.msk.f32.vlgmr.msra.gmra.mrb[0].mxu0 %vm75_vm0, %v63_v16  ;;  %527 = vmatprep.subr.bf16.mxu1 %v526_v15  ;;  %v562_v43 = vpack.c.bf16 %v267_v42, %v266_v41  ;;  %v566_v46 = vpack.c.bf16 %v269_v45, %v268_v44  ;;  %v270_v47 = vld [vmem:[#allocation7 + $0xd0] sm:$0xff]  ;;  %v271_v48 = vld [vmem:[#allocation7 + $0xd8] sm:$0xff]  ;;  %v272_v50 = vld [vmem:[#allocation7 + $0xe0] sm:$0xff] }
  0x42   :  { %551 = vmatprep.subr.bf16.mxu0 %v550_v35  ;;  %v570_v49 = vpack.c.bf16 %v271_v48, %v270_v47  ;;  %v273_v51 = vld [vmem:[#allocation7 + $0xe8] sm:$0xff]  ;;  %v381_v53 = vld [vmem:[%s798_s2] ss:$0 sm:$0xff]  ;;  %v275_v61 = vld [vmem:[#allocation7 + $0xf8] sm:$0xff] }
  0x43   :  { %553 = vmatpush3.bf16.msra.mxu0 %v550_v35  ;;  %v574_v52 = vpack.c.bf16 %v273_v51, %v272_v50  ;;  %v274_v60 = vld [vmem:[#allocation7 + $0xf0] sm:$0xff] }
  0x44   :  { %529 = vmatpush3.bf16.msra.mxu1 %v526_v15  ;;  %555 = vmatprep.subr.bf16.mxu0 %v554_v37  ;;  %v578_v62 = vpack.c.bf16 %v275_v61, %v274_v60  ;;  %v384_v63 = vld [vmem:[%s800_s4] ss:$0 sm:$0xff]  ;;  %v386_v6 = vld [vmem:[%s800_s4 + $0x1] ss:$0 sm:$0xff] }
  0x45   :  { %531 = vmatprep.subr.bf16.mxu1 %v530_v19 }
  0x47   :  { %557 = vmatpush3.bf16.msra.mxu0 %v554_v37 }
  0x48   :  { %533 = vmatpush3.bf16.msra.mxu1 %v530_v19  ;;  %559 = vmatprep.subr.bf16.mxu0 %v558_v40 }
  0x49   :  { %535 = vmatprep.subr.bf16.mxu1 %v534_v22 }
  0x4b   :  { %561 = vmatpush3.bf16.msra.mxu0 %v558_v40 }
  0x4c   :  { %537 = vmatpush3.bf16.msra.mxu1 %v534_v22  ;;  %563 = vmatprep.subr.bf16.mxu0 %v562_v43 }
  0x4d   :  { %539 = vmatprep.subr.bf16.mxu1 %v538_v25 }
  0x4f   :  { %565 = vmatpush3.bf16.msra.mxu0 %v562_v43 }
  0x50   :  { %541 = vmatpush3.bf16.msra.mxu1 %v538_v25  ;;  %567 = vmatprep.subr.bf16.mxu0 %v566_v46 }
  0x51   :  { %543 = vmatprep.subr.bf16.mxu1 %v542_v28 }
  0x53   :  { %569 = vmatpush3.bf16.msra.mxu0 %v566_v46 }
  0x54   :  { %545 = vmatpush3.bf16.msra.mxu1 %v542_v28  ;;  %571 = vmatprep.subr.bf16.mxu0 %v570_v49 }
  0x55   :  { %547 = vmatprep.subr.bf16.mxu1 %v546_v31 }
  0x57   :  { %573 = vmatpush3.bf16.msra.mxu0 %v570_v49 }
  0x58   :  { %549 = vmatpush3.bf16.msra.mxu1 %v546_v31  ;;  %575 = vmatprep.subr.bf16.mxu0 %v574_v52 }
  0x5b   :  { %577 = vmatpush3.bf16.msra.mxu0 %v574_v52 }
  0x5c   :  { %579 = vmatprep.subr.bf16.mxu0 %v578_v62 }
  0x5f   :  { %581 = vmatpush3.bf16.msra.mxu0 %v578_v62 }
 0x114   :  { %v439_v54 = vpop.f32.mrb[0].mxu0 }
 0x115   :  { %v154_v55 = vadd.f32 %v439_v54, %v381_v53  ;;  %v148_v56 = vpop.f32.mrb[1].mxu0 }
 0x116   :  { %v149_v57 = vadd.f32 %v381_v53, %v148_v56 }
 0x117   :  { %v158_v59 = vmax.f32 %v154_v55, 0.0 }
 0x118   :  { %v157_v58 = vmax.f32 %v149_v57, 0.0 }
 0x11a   :  { %472 = vmatprep.mubr.f32.mxu1 %v157_v58 }
 0x11b   :  { %473 = vmatmul.mubr.f32.vlgmr.msra.gmra.mrb[0].mxu1 %v158_v59 }
 0x1ee   :  { %v474_v0 = vpop.f32.mrb[0].mxu1 }
 0x1ef   :  { %v254_v1 = vadd.f32 %v474_v0, %v384_v63  ;;  %v248_v2 = vpop.f32.mrb[1].mxu1 }
 0x1f0   :  { %v249_v3 = vadd.f32 %v384_v63, %v248_v2 }
 0x1f1   :  { %v258_v5 = vmax.f32 %v254_v1, 0.0 }
 0x1f2   :  { %v257_v4 = vmax.f32 %v249_v3, 0.0 }
 0x1f4   :  { %507 = vmatprep.mubr.f32.mxu0 %v257_v4 }
 0x1f5   :  { %508 = vmatmul.mubr.f32.vlgmr.msra.gmra.mrb[2].mxu0 %v258_v5 }
 0x2c8   :  { %v509_v7 = vpop.f32.mrb[2].mxu0 }
 0x2c9   :  { %v356_v8 = vadd.f32 %v509_v7, %v386_v6  ;;  %v350_v9 = vpop.f32.mrb[3].mxu0 }
 0x2ca   :  { %v351_v10 = vadd.f32 %v386_v6, %v350_v9 }
 0x2cb   :  { %v360_v11 = vmax.f32 %v356_v8, 0.0 }
 0x2cc   :  { %v359_v12 = vmax.f32 %v351_v10, 0.0 }
 0x2cd   :  { %362 = vst [vmem:[#allocation8 + $0x8] sm:$0xff] %v360_v11 }
 0x2ce   :  { %361 = vst [vmem:[#allocation8] sm:$0xff] %v359_v12 }
 0x2cf   :  { %665 = shalt.err (!%p662_p0)
}
 0x2d0   :  { %s666_s14 = scalar_lea.hbm %s801_s5, 256 }
 0x2d1   :  { %p667_p1 = scmp.ne.s32.totalorder %s801_s5, %s666_s14  ;;  %p670_p2 = scmp.lt.u32.totalorder %s666_s14, %s801_s5 }
 0x2d3   :  { %p672_p3 = pnand %p670_p2, %p667_p1 }
 0x2d5   :  { %675 = shalt.err (!%p672_p3)
}
 0x2d6   :  { %374 = dma.vmem_to_hbm [thread:$0]  %s369_s11, 256, %s801_s5, [#allocation4], %s684_s30, %s684_s30, %s685_s6  }
 0x2d7   :  { %680 = dma.done.wait [#allocation4], 256  }
 0x2d8   :  { %681 = vsyncadd [#allocation4], 4294967040 }
 0x2d9   :  { %378 = vsyncpa [#allocation3], 1 }
 0x2da   :  { %379 = vsyncpa [#allocation6], 1 }
 0x2db   :  { %380 = vsyncpa [#allocation4], 1 }

</bundles_post_ra>
